<compile_context>
chip_gen: v5e
topology: v5e:2x2
jax: 0.10.0
libtpu: 0.0.40
codegen_flags: <defaults>
</compile_context>

<pallas_src>
import jax
import jax.numpy as jnp
from jax.experimental import pallas as pl
from jax.experimental.pallas import tpu as pltpu

NUM_FEATURE_POINTS = 69
H1, H2, H3 = 128, 64, 1
DEFAULT_BATCH_TILE = 8192


def fcn_kernel(x_ref, w1_ref, b1_ref, w2_ref, b2_ref, w3_ref, b3_ref, o_ref):
    # x arrives in its HBM dtype; cast to bf16 on the VPU (hidden under MXU slack).
    x = x_ref[...].astype(jnp.bfloat16)                               # (TB, 69)

    # fc1 + ReLU  (MXU bf16 x bf16 -> f32 accumulate)
    h1 = jnp.dot(x, w1_ref[...], preferred_element_type=jnp.float32) + b1_ref[...]
    h1 = jnp.maximum(h1, 0.0)                                         # (TB, 128) f32

    # fc2 + ReLU
    h2 = jnp.dot(h1.astype(jnp.bfloat16), w2_ref[...],
                 preferred_element_type=jnp.float32) + b2_ref[...]
    h2 = jnp.maximum(h2, 0.0)                                         # (TB, 64) f32

    # fc3 + Sigmoid, lane-dense: (1, 64) @ (TB, 64)^T -> (1, TB) row (A @ B^T MXU form),
    # so the epilogue runs on dense 128-lane vregs instead of a (TB, 1) column.
    logits = jax.lax.dot_general(
        w3_ref[...], h2.astype(jnp.bfloat16),
        dimension_numbers=(((1,), (1,)), ((), ())),
        preferred_element_type=jnp.float32) + b3_ref[...]             # (1, TB) f32
    o_ref[...] = jax.nn.sigmoid(logits)


def _round_up(n, m):
    return ((n + m - 1) // m) * m


def _choose_batch_tile(batch, cap):
    """Pick a batch tile: large enough to amortize per-grid-step overhead, balanced to an
    even tile count when there is enough work (dual TensorCores on v7x), rows a multiple
    of 8 (tiny batches) or 128 (otherwise)."""
    grain = 128 if batch >= 256 else 8
    bg = _round_up(max(batch, 1), grain)
    if bg <= grain:
        return bg
    if bg <= 2 * cap:
        if bg >= 2048:                        # enough work to split across two cores
            return _round_up(pl.cdiv(bg, 2), grain)
        return bg
    n_tiles = _round_up(pl.cdiv(bg, cap), 2)  # even number of ~cap-sized tiles
    return _round_up(pl.cdiv(bg, n_tiles), grain)


def simple_fcn_forward(x, params, batch_tile=DEFAULT_BATCH_TILE):
    """x: (B, 69) float array -> (B, 1) float32."""
    w1, b1, w2, b2, w3, b3 = params
    B = x.shape[0]

    tb = _choose_batch_tile(B, batch_tile)
    num_tiles = pl.cdiv(B, tb)

    def resident(shape):
        # Whole (small) array, fetched once and kept VMEM-resident across the grid.
        return pl.BlockSpec(shape, lambda i: (0, 0))

    out = pl.pallas_call(
        fcn_kernel,
        out_shape=jax.ShapeDtypeStruct((num_tiles, tb), jnp.float32),
        grid=(num_tiles,),
        in_specs=[
            pl.BlockSpec((tb, NUM_FEATURE_POINTS), lambda i: (i, 0)),  # x: streamed per tile
            resident((NUM_FEATURE_POINTS, H1)),                        # w1 (bf16)
            resident((1, H1)),                                         # b1 (f32)
            resident((H1, H2)),                                        # w2 (bf16)
            resident((1, H2)),                                         # b2 (f32)
            resident((1, H2)),                                         # w3 as a (1, 64) bf16 row
            resident((1, 1)),                                          # b3 (f32)
        ],
        out_specs=pl.BlockSpec((1, tb), lambda i: (i, 0)),             # lane-dense (1, TB) rows
        compiler_params=pltpu.CompilerParams(
            dimension_semantics=("parallel",),   # shard batch tiles across TCs on v7x
        ),
    )(x, w1, b1, w2, b2, w3, b3)

    # (num_tiles, tb) -> (num_tiles*tb, 1); rows beyond B (ragged last tile) are dropped.
    return out.reshape(-1, 1)[:B]


def init_params(key):
    """Deterministic init matching PyTorch nn.Linear default (uniform +/- 1/sqrt(fan_in)).
    Layout: w1/w2 as (in, out) bf16; w3 as a (1, 64) bf16 row; biases as f32 rows."""
    def linear(key, fan_in, fan_out):
        kw, kb = jax.random.split(key)
        bound = 1.0 / jnp.sqrt(float(fan_in))
        w = jax.random.uniform(kw, (fan_in, fan_out), jnp.float32, -bound, bound)
        b = jax.random.uniform(kb, (1, fan_out), jnp.float32, -bound, bound)
        return w, b

    k1, k2, k3 = jax.random.split(key, 3)
    w1, b1 = linear(k1, NUM_FEATURE_POINTS, H1)
    w2, b2 = linear(k2, H1, H2)
    w3, b3 = linear(k3, H2, H3)
    return (
        w1.astype(jnp.bfloat16), b1,
        w2.astype(jnp.bfloat16), b2,
        w3.reshape(1, H2).astype(jnp.bfloat16), b3.reshape(1, 1),
    )


def reference_forward_matched(x, params):
    """Pure-JAX reference with the SAME numerics as the kernel (bf16 matmul inputs, f32 accum)."""
    w1, b1, w2, b2, w3, b3 = params
    h1 = jax.nn.relu(jnp.dot(x.astype(jnp.bfloat16), w1,
                             preferred_element_type=jnp.float32) + b1)
    h2 = jax.nn.relu(jnp.dot(h1.astype(jnp.bfloat16), w2,
                             preferred_element_type=jnp.float32) + b2)
    logits = jnp.dot(h2.astype(jnp.bfloat16), w3.T,
                     preferred_element_type=jnp.float32) + b3
    return jax.nn.sigmoid(logits)


def reference_forward_f32(x, params):
    """Full-f32 reference (module semantics); looser sanity check vs the bf16 kernel."""
    w1, b1, w2, b2, w3, b3 = params
    h1 = jax.nn.relu(x @ w1.astype(jnp.float32) + b1)
    h2 = jax.nn.relu(h1 @ w2.astype(jnp.float32) + b2)
    logits = h2 @ w3.astype(jnp.float32).T + b3
    return jax.nn.sigmoid(logits)


if __name__ == "__main__":
    key = jax.random.PRNGKey(0)
    kx, kx2, kx3, kp = jax.random.split(key, 4)
    params = init_params(kp)

    # Small primary check (single tile).
    B = 8
    x = jax.random.normal(kx, (B, NUM_FEATURE_POINTS), dtype=jnp.float32)
    out = jax.block_until_ready(simple_fcn_forward(x, params))
    assert out.shape == (B, H3), out.shape
    ref = reference_forward_matched(x, params)
    assert jnp.allclose(out, ref, atol=2e-3, rtol=2e-3), "mismatch vs. matched-precision reference"
    assert jnp.allclose(out, reference_forward_f32(x, params), atol=3e-2), "mismatch vs. f32 reference"

    # Two balanced tiles (default tile selection) with a ragged last tile.
    B2 = 2500
    x2 = jax.random.normal(kx2, (B2, NUM_FEATURE_POINTS), dtype=jnp.float32)
    out2 = jax.block_until_ready(simple_fcn_forward(x2, params))
    assert out2.shape == (B2, H3), out2.shape
    assert jnp.allclose(out2, reference_forward_matched(x2, params), atol=2e-3, rtol=2e-3), \
        "mismatch (2-tile batch) vs. reference"

    # Multi-tile grid with an explicit small tile (exercises >2 tiles + ragged boundary).
    B3 = 1300
    x3 = jax.random.normal(kx3, (B3, NUM_FEATURE_POINTS), dtype=jnp.float32)
    out3 = jax.block_until_ready(simple_fcn_forward(x3, params, batch_tile=512))
    assert out3.shape == (B3, H3), out3.shape
    assert jnp.allclose(out3, reference_forward_matched(x3, params), atol=2e-3, rtol=2e-3), \
        "mismatch (multi-tile batch) vs. reference"

    print("KERNEL_OK")
</pallas_src>

<mosaic_0001>
module attributes {stable_mosaic.version = 11 : i64} {
  func.func @fcn_kernel(%arg0: i32, %arg1: memref<8x69xf32, #tpu.memory_space<vmem>>, %arg2: memref<69x128xbf16, #tpu.memory_space<vmem>>, %arg3: memref<1x128xf32, #tpu.memory_space<vmem>>, %arg4: memref<128x64xbf16, #tpu.memory_space<vmem>>, %arg5: memref<1x64xf32, #tpu.memory_space<vmem>>, %arg6: memref<1x64xbf16, #tpu.memory_space<vmem>>, %arg7: memref<1x1xf32, #tpu.memory_space<vmem>>, %arg8: memref<1x8xf32, #tpu.memory_space<vmem>>) attributes {dimension_semantics = [#tpu.dimension_semantics<parallel>], iteration_bounds = array<i64: 1>, scalar_prefetch = 0 : i64, scratch_operands = 0 : i64, tpu.core_type = #tpu.core_type<tc>, window_params = [{transform_indices = @transform_0, window_bounds = array<i64: 8, 69>}, {pipeline_mode = #tpu.pipeline_mode<synchronous>, transform_indices = @transform_1, window_bounds = array<i64: 69, 128>}, {pipeline_mode = #tpu.pipeline_mode<synchronous>, transform_indices = @transform_2, window_bounds = array<i64: 1, 128>}, {pipeline_mode = #tpu.pipeline_mode<synchronous>, transform_indices = @transform_3, window_bounds = array<i64: 128, 64>}, {pipeline_mode = #tpu.pipeline_mode<synchronous>, transform_indices = @transform_4, window_bounds = array<i64: 1, 64>}, {pipeline_mode = #tpu.pipeline_mode<synchronous>, transform_indices = @transform_5, window_bounds = array<i64: 1, 64>}, {pipeline_mode = #tpu.pipeline_mode<synchronous>, transform_indices = @transform_6, window_bounds = array<i64: 1, 1>}, {transform_indices = @transform_7, window_bounds = array<i64: 1, 8>}]} {
    %c0 = arith.constant 0 : index
    %c0_0 = arith.constant 0 : index
    %0 = vector.load %arg1[%c0, %c0_0] : memref<8x69xf32, #tpu.memory_space<vmem>>, vector<8x69xf32>
    %1 = arith.truncf %0 : vector<8x69xf32> to vector<8x69xbf16>
    %c0_1 = arith.constant 0 : index
    %c0_2 = arith.constant 0 : index
    %2 = vector.load %arg2[%c0_1, %c0_2] : memref<69x128xbf16, #tpu.memory_space<vmem>>, vector<69x128xbf16>
    %cst = arith.constant dense<0.000000e+00> : vector<8x128xf32>
    %3 = tpu.matmul %1, %2, %cst {dimension_numbers = #tpu.dot_dimension_numbers<[1], [0], [0], [1], [0, 0, 1, 1], [], []>} : vector<8x69xbf16>, vector<69x128xbf16>, vector<8x128xf32> -> vector<8x128xf32>
    %c0_3 = arith.constant 0 : index
    %c0_4 = arith.constant 0 : index
    %4 = vector.load %arg3[%c0_3, %c0_4] : memref<1x128xf32, #tpu.memory_space<vmem>>, vector<1x128xf32>
    %5 = vector.broadcast %4 : vector<1x128xf32> to vector<8x128xf32>
    %6 = arith.addf %3, %5 : vector<8x128xf32>
    %cst_5 = arith.constant 0.000000e+00 : f32
    %7 = vector.broadcast %cst_5 : f32 to vector<8x128xf32>
    %8 = arith.maximumf %6, %7 : vector<8x128xf32>
    %9 = arith.truncf %8 : vector<8x128xf32> to vector<8x128xbf16>
    %c0_6 = arith.constant 0 : index
    %c0_7 = arith.constant 0 : index
    %10 = vector.load %arg4[%c0_6, %c0_7] : memref<128x64xbf16, #tpu.memory_space<vmem>>, vector<128x64xbf16>
    %cst_8 = arith.constant dense<0.000000e+00> : vector<8x64xf32>
    %11 = tpu.matmul %9, %10, %cst_8 {dimension_numbers = #tpu.dot_dimension_numbers<[1], [0], [0], [1], [0, 0, 1, 1], [], []>} : vector<8x128xbf16>, vector<128x64xbf16>, vector<8x64xf32> -> vector<8x64xf32>
    %c0_9 = arith.constant 0 : index
    %c0_10 = arith.constant 0 : index
    %12 = vector.load %arg5[%c0_9, %c0_10] : memref<1x64xf32, #tpu.memory_space<vmem>>, vector<1x64xf32>
    %13 = vector.broadcast %12 : vector<1x64xf32> to vector<8x64xf32>
    %14 = arith.addf %11, %13 : vector<8x64xf32>
    %cst_11 = arith.constant 0.000000e+00 : f32
    %15 = vector.broadcast %cst_11 : f32 to vector<8x64xf32>
    %16 = arith.maximumf %14, %15 : vector<8x64xf32>
    %c0_12 = arith.constant 0 : index
    %c0_13 = arith.constant 0 : index
    %17 = vector.load %arg6[%c0_12, %c0_13] : memref<1x64xbf16, #tpu.memory_space<vmem>>, vector<1x64xbf16>
    %18 = arith.truncf %16 : vector<8x64xf32> to vector<8x64xbf16>
    %cst_14 = arith.constant dense<0.000000e+00> : vector<1x8xf32>
    %19 = tpu.matmul %17, %18, %cst_14 {dimension_numbers = #tpu.dot_dimension_numbers<[1], [1], [0], [0], [0, 0, 1, 0], [], []>} : vector<1x64xbf16>, vector<8x64xbf16>, vector<1x8xf32> -> vector<1x8xf32>
    %c0_15 = arith.constant 0 : index
    %c0_16 = arith.constant 0 : index
    %20 = vector.load %arg7[%c0_15, %c0_16] : memref<1x1xf32, #tpu.memory_space<vmem>>, vector<1x1xf32>
    %21 = vector.broadcast %20 : vector<1x1xf32> to vector<1x8xf32>
    %22 = arith.addf %19, %21 : vector<1x8xf32>
    %23 = arith.negf %22 : vector<1x8xf32>
    %24 = math.exp %23 : vector<1x8xf32>
    %cst_17 = arith.constant 1.000000e+00 : f32
    %25 = vector.broadcast %cst_17 : f32 to vector<1x8xf32>
    %26 = arith.addf %25, %24 : vector<1x8xf32>
    %27 = arith.divf %25, %26 : vector<1x8xf32>
    %c0_18 = arith.constant 0 : index
    %c0_19 = arith.constant 0 : index
    %28 = vector.load %arg8[%c0_18, %c0_19] : memref<1x8xf32, #tpu.memory_space<vmem>>, vector<1x8xf32>
    tpu.vector_store %arg8[%c0_18, %c0_19], %27 {strides = array<i32>} : memref<1x8xf32, #tpu.memory_space<vmem>>, vector<1x8xf32>,
    return
  }
  func.func @transform_0(%arg0: i32) -> (i32, i32) {
    %c0_i32 = arith.constant 0 : i32
    %c0_i32_0 = arith.constant 0 : i32
    return %arg0, %c0_i32 : i32, i32
  }
  func.func @transform_1(%arg0: i32) -> (i32, i32) {
    %c0_i32 = arith.constant 0 : i32
    %c0_i32_0 = arith.constant 0 : i32
    %c0_i32_1 = arith.constant 0 : i32
    return %c0_i32, %c0_i32_0 : i32, i32
  }
  func.func @transform_2(%arg0: i32) -> (i32, i32) {
    %c0_i32 = arith.constant 0 : i32
    %c0_i32_0 = arith.constant 0 : i32
    %c0_i32_1 = arith.constant 0 : i32
    return %c0_i32, %c0_i32_0 : i32, i32
  }
  func.func @transform_3(%arg0: i32) -> (i32, i32) {
    %c0_i32 = arith.constant 0 : i32
    %c0_i32_0 = arith.constant 0 : i32
    %c0_i32_1 = arith.constant 0 : i32
    return %c0_i32, %c0_i32_0 : i32, i32
  }
  func.func @transform_4(%arg0: i32) -> (i32, i32) {
    %c0_i32 = arith.constant 0 : i32
    %c0_i32_0 = arith.constant 0 : i32
    %c0_i32_1 = arith.constant 0 : i32
    return %c0_i32, %c0_i32_0 : i32, i32
  }
  func.func @transform_5(%arg0: i32) -> (i32, i32) {
    %c0_i32 = arith.constant 0 : i32
    %c0_i32_0 = arith.constant 0 : i32
    %c0_i32_1 = arith.constant 0 : i32
    return %c0_i32, %c0_i32_0 : i32, i32
  }
  func.func @transform_6(%arg0: i32) -> (i32, i32) {
    %c0_i32 = arith.constant 0 : i32
    %c0_i32_0 = arith.constant 0 : i32
    %c0_i32_1 = arith.constant 0 : i32
    return %c0_i32, %c0_i32_0 : i32, i32
  }
  func.func @transform_7(%arg0: i32) -> (i32, i32) {
    %c0_i32 = arith.constant 0 : i32
    %c0_i32_0 = arith.constant 0 : i32
    return %arg0, %c0_i32 : i32, i32
  }
}

</mosaic_0001>

<bundles_post_ra>
// kernel: tpu_custom_call.1
= control target key start
LH: loop header
LB: loop body
LE: loop exit
PB: predicated region body
PF: predicated region fallthrough
CT: control target
= control target key end

     0   :  { %s445_s0 = inlined_call_operand.vmem [shape: f32[8,69], index: 0, kind: input, shape index: {}]   ;;  %s446_s1 = inlined_call_operand.vmem [shape: bf16[69,128], index: 1, kind: input, shape index: {}]   ;;  %s447_s2 = inlined_call_operand.vmem [shape: f32[1,128], index: 2, kind: input, shape index: {}]   ;;  %s448_s3 = inlined_call_operand.vmem [shape: bf16[128,64], index: 3, kind: input, shape index: {}]   ;;  %s449_s4 = inlined_call_operand.vmem [shape: f32[1,64], index: 4, kind: input, shape index: {}]   ;;  %s450_s5 = inlined_call_operand.vmem [shape: bf16[1,64], index: 5, kind: input, shape index: {}]   ;;  %s451_s6 = inlined_call_operand.<no memory space> [shape: f32[1,1], index: 6, kind: input, shape index: {}]   ;;  %s452_s7 = inlined_call_operand.hbm [shape: f32[1,8], index: 7, kind: output, shape index: {}]  }
   0x1   :  { %v12_v0 = vstv %s451_s6 }
   0x2   :  { %13 = vst [vmem:[#allocation2] sm:$0x1] %v12_v0 }
   0x3   :  { %v40_v1 = vld [vmem:[%s446_s1 + $0x20] sm:$0x7]  ;;  %vm76_vm0 = vcmask 1041408   ;;  %vm77_vm1 = vcmask 1042432   ;;  %v345_v3 = vmov 65535   ;;  %v308_v6 = vld [vmem:[%s448_s3 + $0x38] sm:$0xff] }
   0x4   :  { %v62_v2 = vunpack.c.l.b16 %v40_v1  ;;  %v78_v4 = vsel %vm76_vm0, 4294967295, %v345_v3  ;;  %166 = vmatpush.bf16.msra.mxu1 %v308_v6  ;;  %v307_v8 = vld [vmem:[%s448_s3 + $0x30] sm:$0xff] }
   0x5   :  { %v79_v5 = vsel %vm77_vm1, %v78_v4, 0 }
   0x6   :  { %v67_v7 = vpack.c.b16 %v62_v2, %v62_v2 }
   0x8   :  { %v81_v9 = vand.u32 %v79_v5, %v67_v7 }
   0x9   :  { %14 = vsyncpa [#allocation4], 0  ;;  %v300_v10 = vld [vmem:[%s446_s1 + $0x18] sm:$0xff]  ;;  %167 = vmatpush.bf16.msra.mxu1 %v307_v8  ;;  %v306_v11 = vld [vmem:[%s448_s3 + $0x28] sm:$0xff]  ;;  %vm72_vm2 = vcmask 564224   ;;  %v346_v29 = vmov 0  }
   0xa   :  { %86 = vmatpush.bf16.msra.mxu0 %v81_v9  ;;  %v299_v12 = vld [vmem:[%s446_s1 + $0x10] sm:$0xff]  ;;  %v305_v13 = vld [vmem:[%s448_s3 + $0x20] sm:$0xff]  ;;  %v298_v14 = vld [vmem:[%s446_s1 + $0x8] sm:$0xff]  ;;  %312 = vset.pattern.permute.xlu0 %v346_v29  ;;  %vm189_vm3 = vcmask 523264   ;;  %s237_s10 = sshll.u32 %s452_s7, 4  ;;  %vm228_vm7 = vcmask 57344   ;;  %s238_s10 = int_to_ptr.hbm [resolvable:$true] %s237_s10 }
   0xb   :  { %v304_v15 = vld [vmem:[%s448_s3 + $0x18] sm:$0xff]  ;;  %v297_v16 = vld [vmem:[%s446_s1] sm:$0xff]  ;;  %v303_v18 = vld [vmem:[%s448_s3 + $0x10] sm:$0xff] }
   0xc   :  { %v30_v17 = vld [vmem:[%s445_s0] sm:$0xff]  ;;  %v302_v20 = vld [vmem:[%s448_s3 + $0x8] sm:$0xff] }
   0xd   :  { %168 = vmatpush.bf16.msra.mxu1 %v306_v11  ;;  %v31_v19 = vpack.c.bf16 %v30_v17, %v30_v17  ;;  %v301_v21 = vld [vmem:[%s448_s3] sm:$0xff] }
   0xe   :  { %87 = vmatpush.bf16.msra.mxu0 %v300_v10  ;;  %v313_v22 = vld [vmem:[%s447_s2] ss:$0 sm:$0xff] }
   0xf   :  { %v182_v28 = vld [vmem:[#allocation2] sm:$0x1] }
  0x10   :  { %185 = vperm.xlu0 %312, %v182_v28   ;;  %v314_v30 = vld [vmem:[%s449_s4] ss:$0 sm:$0xff]  ;;  %s347_s4 = smov [#allocation3]  }
  0x11   :  { %169 = vmatpush.bf16.msra.mxu1 %v305_v13  ;;  %v180_v37 = vld [vmem:[%s450_s5] sm:$0x1]  ;;  %s235_s5 = sshll.u32 %s347_s4, 4  ;;  %s236_s5 = int_to_ptr.vmem [resolvable:$true] %s235_s5 }
  0x12   :  { %88 = vmatpush.bf16.msra.mxu0 %v299_v12 }
  0x15   :  { %170 = vmatpush.bf16.msra.mxu1 %v304_v15 }
  0x16   :  { %89 = vmatpush.bf16.msra.mxu0 %v298_v14 }
  0x19   :  { %171 = vmatpush.bf16.msra.mxu1 %v303_v18 }
  0x1a   :  { %90 = vmatpush.bf16.msra.mxu0 %v297_v16 }
  0x1d   :  { %262 = vmatmul.msk.bf16.vlgmr.msra.gmra.mxu0 %vm72_vm2, %v31_v19  ;;  %172 = vmatpush.bf16.msra.mxu1 %v302_v20 }
  0x21   :  { %173 = vmatpush.bf16.msra.mxu1 %v301_v21 }
  0x82   :  { %v186_v38 = vpop.permute.xlu0 %185 }
  0x83   :  { %v188_v39 = vperm.slane %v186_v38, 0 }
  0x9a   :  { %v92_v23 = vpop.f32.mrf.mxu0 }
  0x9b   :  { %v93_v24 = vadd.f32 %v313_v22, %v92_v23 }
  0x9d   :  { %v96_v25 = vmax.f32 %v93_v24, 0.0 }
  0x9f   :  { %v97_v26 = vpack.c.bf16 %v96_v25, %v96_v25 }
  0xa1   :  { %174 = vmatmul.bf16.vlgmr.msra.gmra.mxu1 %v97_v26 }
  0xa2   :  { %v94_v27 = vpop.f32.mrf.mxu0 }
 0x11e   :  { %v175_v31 = vpop.f32.mrf.mxu1 }
 0x11f   :  { %v176_v32 = vadd.f32 %v314_v30, %v175_v31 }
 0x121   :  { %v179_v33 = vmax.f32 %v176_v32, 0.0 }
 0x123   :  { %v181_v34 = vpack.c.bf16 %v179_v33, %v179_v33 }
 0x125   :  { %v194_v35 = vsel %vm189_vm3, %v181_v34, 0 }
 0x126   :  { %v177_v36 = vpop.f32.mrf.mxu1  ;;  %203 = vmatpush.bf16.xpose.msra.mxu2 %v194_v35 }
 0x12d   :  { %295 = vmatmul.msk.bf16.vlgmr.msra.gmra.mxu2 %vm189_vm3, %v180_v37 }
 0x1b0   :  { %v205_v40 = vpop.f32.mrf.mxu2 }
 0x1b1   :  { %v206_v41 = vadd.f32 %v205_v40, %v188_v39 }
 0x1b3   :  { %v296_v42 = vmul.f32 -1.442695, %v206_v41 }
 0x1b5   :  { %315 = vpow2.f32 %v296_v42 }
 0x1b8   :  { %v207_v43 = vpop.f32.mrf.mxu2 }
 0x1bb   :  { %v316_v44 = vpop.eup %315 }
 0x1bc   :  { %v212_v45 = vadd.f32 1.0, %v316_v44 }
 0x1be   :  { %317 = vrcp.f32 %v212_v45  ;;  %v224_v49 = vand.u32 2147483648, %v212_v45  ;;  %v222_v51 = vand.u32 2147483647, %v212_v45  ;;  %vm218_vm5 = vweird.f32 %v212_v45 }
 0x1c0   :  { %v225_v53 = vor.u32 1.1754944e-38, %v224_v49  ;;  %vm223_vm8 = vcmp.eq.f32.partialorder %v222_v51, 8.507059e+37 }
 0x1c4   :  { %v318_v46 = vpop.eup %317 }
 0x1c5   :  { %v214_v47 = vmul.f32 %v318_v46, %v212_v45  ;;  %vm219_vm4 = vweird.f32 %v318_v46 }
 0x1c6   :  { %vm220_vm6 = vmor %vm218_vm5, %vm219_vm4 }
 0x1c7   :  { %v215_v48 = vsub.f32 1.0, %v214_v47 }
 0x1c9   :  { %v216_v50 = vmul.f32 %v318_v46, %v215_v48 }
 0x1cb   :  { %v217_v52 = vadd.f32 %v318_v46, %v216_v50 }
 0x1cd   :  { %v221_v54 = vsel %vm220_vm6, %v318_v46, %v217_v52 }
 0x1ce   :  { %v226_v55 = vsel %vm223_vm8, %v225_v53, %v221_v54 }
 0x1cf   :  { %229 = vst.msk [vmem:[#allocation3] sm:$0x1] %vm228_vm7, %v226_v55 }
 0x1d0   :  { %240 = dma.vmem_to_hbm [thread:$0]  %s236_s5, 16, %s238_s10, [#allocation4]  }
 0x1d1   :  { %343 = dma.done.wait [#allocation4], 16  }
 0x1d2   :  { %344 = vsyncadd [#allocation4], 4294967280 }
 0x1d3   :  { %245 = vsyncpa [#allocation4], 1 }

</bundles_post_ra>
